<compile_context>
chip_gen: v7x
topology: tpu7x:2x2x1
jax: 0.10.0
libtpu: 0.0.40
codegen_flags: <defaults>
</compile_context>

<pallas_src>
import math

import jax
import jax.numpy as jnp
import numpy as np
from jax.experimental import pallas as pl
from jax.experimental.pallas import tpu as pltpu


def _round_up(x, m):
    return (x + m - 1) // m * m


def _link_embed_kernel(idx_ref, table_ref, out_ref):
    """One grid step: embed TILE_N rows of (already vocab-offset) indices.

    idx_ref:   (TILE_N, F)        int32    -- clamp(x[..., f]) + vocab_offset[f]
    table_ref: (V_pad, D_total)   bfloat16 -- block-diagonal stacked tables
    out_ref:   (TILE_N, D_total)  bfloat16 -- concatenated embeddings
    """
    ids = idx_ref[...]                      # (TILE_N, F) int32
    tbl = table_ref[...]                    # (V_pad, D_total) bf16
    tile_n, num_fields = ids.shape
    v_pad = tbl.shape[0]

    # Boolean multi-hot selection mask: fields live in disjoint vocab ranges,
    # so OR over per-field one-hots == sum.  Compares/ORs stay in bool on the
    # VPU; a single cast to bf16 feeds the MXU (important on v5e: no bf16 VPU).
    lane_ids = jax.lax.broadcasted_iota(jnp.int32, (tile_n, v_pad), 1)
    mask = lane_ids == ids[:, 0:1]
    for f in range(1, num_fields):          # static unroll, num_fields is small
        mask = jnp.logical_or(mask, lane_ids == ids[:, f:f + 1])
    onehot = mask.astype(tbl.dtype)         # 0/1 exact in bf16

    # Single bf16 MXU matmul with f32 accumulation = gather + concat in one shot.
    out_ref[...] = jnp.dot(
        onehot, tbl, preferred_element_type=jnp.float32
    ).astype(out_ref.dtype)


def build_link_embedding_params(tables, *, table_dtype=jnp.bfloat16):
    """One-time parameter build (mirrors module __init__).

    tables: list of (V_i, D_i) float32 embedding weights (one per field).
    Returns a dict holding the block-diagonal stacked table (device array in
    `table_dtype`) plus the static offsets/sizes needed by the forward pass.
    """
    vocab_sizes = [int(t.shape[0]) for t in tables]
    dims = [int(t.shape[1]) for t in tables]
    d_total = sum(dims)
    v_total = sum(vocab_sizes)
    # 256-aligned contraction dim: matches the 256x256 MXU on v6e/v7x and is
    # already a multiple of 128 for v5e.  Zero-padded rows contribute exactly 0.
    v_pad = _round_up(v_total, 256)

    voffs = np.cumsum([0] + vocab_sizes)[:-1].astype(np.int32)
    doffs = np.cumsum([0] + dims)[:-1].astype(np.int32)

    # Host-side build of the block-diagonal stacked table (field i occupies
    # rows [voff_i, voff_i+V_i) and columns [doff_i, doff_i+D_i)); done once,
    # not per forward call.
    w_all = np.zeros((v_pad, d_total), np.float32)
    for t, vo, do in zip(tables, voffs, doffs):
        v, d = int(t.shape[0]), int(t.shape[1])
        w_all[vo:vo + v, do:do + d] = np.asarray(t, np.float32)

    return {
        "table": jnp.asarray(w_all, table_dtype),          # (v_pad, d_total)
        "voffs": jnp.asarray(voffs, jnp.int32),            # (F,)
        "vmax": jnp.asarray([v - 1 for v in vocab_sizes], jnp.int32),  # (F,)
        "vocab_sizes": vocab_sizes,
        "dims": dims,
        "d_total": d_total,
        "v_pad": v_pad,
    }


def link_feature_embedding(x, params, *, tile_n=512, out_dtype=jnp.bfloat16):
    """Functional forward of LinkFeatureEmbedding.

    x:      (batch, seq, num_fields) integer indices
    params: dict from build_link_embedding_params
    returns (batch, seq, sum(D_i)) in `out_dtype`
    """
    batch, seq, num_fields = x.shape
    assert num_fields == len(params["vocab_sizes"]), "one table per field expected"

    w_all = params["table"]
    d_total = params["d_total"]
    v_pad = params["v_pad"]

    # Clamp each field into its valid range (PyTorch would raise on OOR; here
    # an unclamped index would bleed into the next field's vocab block), then
    # offset into the stacked-table row range.
    idx = jnp.clip(x.astype(jnp.int32), 0, params["vmax"]) + params["voffs"]

    n = batch * seq
    idx = idx.reshape(n, num_fields)

    # Keep >= 2 grid steps so the "parallel" axis can shard across both
    # TensorCores on v7x; never go below one 128-row tile.
    tile_n = int(max(128, min(tile_n, _round_up(pl.cdiv(n, 2), 128))))
    n_pad = _round_up(n, tile_n)
    if n_pad != n:
        # Padded rows -> idx 0 for every field -> a single lane-0 one-hot;
        # harmless, and sliced off below.  Do not reuse the padded region.
        idx = jnp.pad(idx, ((0, n_pad - n), (0, 0)))

    grid = (n_pad // tile_n,)

    itemsize_tbl = jnp.dtype(w_all.dtype).itemsize
    itemsize_out = jnp.dtype(out_dtype).itemsize
    flops = 2 * n_pad * v_pad * d_total
    bytes_accessed = (idx.size * 4 + w_all.size * itemsize_tbl
                      + n_pad * d_total * itemsize_out)

    vmem_need = (w_all.size * itemsize_tbl                             # resident table
                 + 2 * (tile_n * num_fields * 4                        # dbl-buffered idx
                        + tile_n * d_total * itemsize_out)             # dbl-buffered out
                 + tile_n * v_pad * itemsize_tbl)                      # in-kernel one-hot
    # Generation-aware VMEM cap: ~25% headroom below physical per-TC VMEM
    # (v7x: 64 MiB per TensorCore; v5e/v6e: 128 MiB).
    try:
        vmem_cap = int(pltpu.get_tpu_info().vmem_capacity_bytes)
    except Exception:
        vmem_cap = 64 << 20
    vmem_limit = int(min(max(4 * vmem_need, 4 << 20), (vmem_cap * 3) // 4))

    out = pl.pallas_call(
        _link_embed_kernel,
        out_shape=jax.ShapeDtypeStruct((n_pad, d_total), out_dtype),
        grid_spec=pltpu.PrefetchScalarGridSpec(
            num_scalar_prefetch=0,
            grid=grid,
            in_specs=[
                pl.BlockSpec((tile_n, num_fields), lambda i: (i, 0)),
                pl.BlockSpec((v_pad, d_total), lambda i: (0, 0)),  # table stays resident
            ],
            out_specs=pl.BlockSpec((tile_n, d_total), lambda i: (i, 0)),
        ),
        compiler_params=pltpu.CompilerParams(
            dimension_semantics=("parallel",),
            vmem_limit_bytes=vmem_limit,
        ),
        cost_estimate=pl.CostEstimate(
            flops=flops, transcendentals=0, bytes_accessed=bytes_accessed),
    )(idx, w_all)

    return out[:n].reshape(batch, seq, d_total)


if __name__ == "__main__":
    # Small shapes consistent with the module's forward: x is (batch, seq, num_fields).
    feature_ranges = [63, 31, 95, 63]       # vocab sizes = range + 1 = 64, 32, 96, 64 (sum 256)
    embedding_dims = [32, 16, 48, 32]       # concatenated dim = 128 (lane-dense output)
    batch, seq = 8, 32                      # 256 rows

    key = jax.random.PRNGKey(0)
    keys = jax.random.split(key, len(feature_ranges) + 1)

    # nn.Embedding weights with xavier_uniform init (mirrors initialize_embeddings()).
    tables = []
    for k, r, d in zip(keys[:-1], feature_ranges, embedding_dims):
        v = r + 1
        bound = math.sqrt(6.0 / (v + d))
        tables.append(jax.random.uniform(k, (v, d), jnp.float32, -bound, bound))

    # One-time parameter build (stacked bf16 table + offsets).
    params = build_link_embedding_params(tables)

    # Integer ("Long") index tensor with per-field valid ranges [0, range_i].
    maxvals = jnp.asarray([r + 1 for r in feature_ranges], jnp.int32)
    raw = jax.random.randint(keys[-1], (batch, seq, len(feature_ranges)),
                             0, 2 ** 30, jnp.int32)
    x = raw % maxvals

    out = jax.block_until_ready(link_feature_embedding(x, tables and params))

    # Pure-JAX reference: per-field gather + concat (same math as the torch
    # module) against the SAME bf16 table values the kernel uses, so the
    # comparison is exact up to the bf16 cast (0/1 one-hot matmul with f32
    # accumulation reproduces the bf16 table rows bit-for-bit).
    tables_bf16 = [t.astype(jnp.bfloat16) for t in tables]
    ref = jnp.concatenate(
        [jnp.take(t, x[..., i], axis=0) for i, t in enumerate(tables_bf16)],
        axis=-1)

    assert out.shape == (batch, seq, sum(embedding_dims))
    np.testing.assert_allclose(
        np.asarray(out, np.float32), np.asarray(ref, np.float32),
        rtol=1e-6, atol=1e-6)
    print("KERNEL_OK")
</pallas_src>

<mosaic_0001>
module attributes {stable_mosaic.version = 11 : i64} {
  func.func @_link_embed_kernel(%arg0: i32, %arg1: memref<128x4xi32, #tpu.memory_space<vmem>>, %arg2: memref<256x128xbf16, #tpu.memory_space<vmem>>, %arg3: memref<128x128xbf16, #tpu.memory_space<vmem>>) attributes {dimension_semantics = [#tpu.dimension_semantics<parallel>], iteration_bounds = array<i64: 2>, scalar_prefetch = 0 : i64, scratch_operands = 0 : i64, tpu.core_type = #tpu.core_type<tc>, window_params = [{transform_indices = @transform_0, window_bounds = array<i64: 128, 4>}, {pipeline_mode = #tpu.pipeline_mode<synchronous>, transform_indices = @transform_1, window_bounds = array<i64: 256, 128>}, {transform_indices = @transform_2, window_bounds = array<i64: 128, 128>}]} {
    %c0 = arith.constant 0 : index
    %c0_0 = arith.constant 0 : index
    %0 = vector.load %arg1[%c0, %c0_0] : memref<128x4xi32, #tpu.memory_space<vmem>>, vector<128x4xi32>
    %c0_1 = arith.constant 0 : index
    %c0_2 = arith.constant 0 : index
    %1 = vector.load %arg2[%c0_1, %c0_2] : memref<256x128xbf16, #tpu.memory_space<vmem>>, vector<256x128xbf16>
    %2 = tpu.iota {dimensions = array<i32: 1>} : vector<128x256xi32>
    %3 = vector.extract_strided_slice %0 {offsets = [0, 0], sizes = [128, 1], strides = [1, 1]} : vector<128x4xi32> to vector<128x1xi32>
    %4 = vector.broadcast %3 : vector<128x1xi32> to vector<128x256xi32>
    %5 = arith.cmpi eq, %2, %4 : vector<128x256xi32>
    %6 = vector.extract_strided_slice %0 {offsets = [0, 1], sizes = [128, 1], strides = [1, 1]} : vector<128x4xi32> to vector<128x1xi32>
    %7 = vector.broadcast %6 : vector<128x1xi32> to vector<128x256xi32>
    %8 = arith.cmpi eq, %2, %7 : vector<128x256xi32>
    %9 = arith.ori %5, %8 : vector<128x256xi1>
    %10 = vector.extract_strided_slice %0 {offsets = [0, 2], sizes = [128, 1], strides = [1, 1]} : vector<128x4xi32> to vector<128x1xi32>
    %11 = vector.broadcast %10 : vector<128x1xi32> to vector<128x256xi32>
    %12 = arith.cmpi eq, %2, %11 : vector<128x256xi32>
    %13 = arith.ori %9, %12 : vector<128x256xi1>
    %14 = vector.extract_strided_slice %0 {offsets = [0, 3], sizes = [128, 1], strides = [1, 1]} : vector<128x4xi32> to vector<128x1xi32>
    %15 = vector.broadcast %14 : vector<128x1xi32> to vector<128x256xi32>
    %16 = arith.cmpi eq, %2, %15 : vector<128x256xi32>
    %17 = arith.ori %13, %16 : vector<128x256xi1>
    %18 = arith.extui %17 : vector<128x256xi1> to vector<128x256xi32>
    %19 = arith.sitofp %18 : vector<128x256xi32> to vector<128x256xf32>
    %20 = arith.truncf %19 : vector<128x256xf32> to vector<128x256xbf16>
    %cst = arith.constant dense<0.000000e+00> : vector<128x128xf32>
    %21 = tpu.matmul %20, %1, %cst {dimension_numbers = #tpu.dot_dimension_numbers<[1], [0], [0], [1], [0, 0, 1, 1], [], []>} : vector<128x256xbf16>, vector<256x128xbf16>, vector<128x128xf32> -> vector<128x128xf32>
    %22 = arith.truncf %21 : vector<128x128xf32> to vector<128x128xbf16>
    %c0_3 = arith.constant 0 : index
    %c0_4 = arith.constant 0 : index
    %23 = vector.load %arg3[%c0_3, %c0_4] : memref<128x128xbf16, #tpu.memory_space<vmem>>, vector<128x128xbf16>
    tpu.vector_store %arg3[%c0_3, %c0_4], %22 {strides = array<i32>} : memref<128x128xbf16, #tpu.memory_space<vmem>>, vector<128x128xbf16>,
    return
  }
  func.func @transform_0(%arg0: i32) -> (i32, i32) {
    %c0_i32 = arith.constant 0 : i32
    %c0_i32_0 = arith.constant 0 : i32
    return %arg0, %c0_i32 : i32, i32
  }
  func.func @transform_1(%arg0: i32) -> (i32, i32) {
    %c0_i32 = arith.constant 0 : i32
    %c0_i32_0 = arith.constant 0 : i32
    %c0_i32_1 = arith.constant 0 : i32
    return %c0_i32, %c0_i32_0 : i32, i32
  }
  func.func @transform_2(%arg0: i32) -> (i32, i32) {
    %c0_i32 = arith.constant 0 : i32
    %c0_i32_0 = arith.constant 0 : i32
    return %arg0, %c0_i32 : i32, i32
  }
}

</mosaic_0001>

<bundles_post_ra>
// kernel: tpu_custom_call.1
= control target key start
LH: loop header
LB: loop body
LE: loop exit
PB: predicated region body
PF: predicated region fallthrough
CT: control target
= control target key end

     0   :  { %7 = vsyncpa [#allocation3], 0  ;;  %s2397_s0 = inlined_call_operand.vmem [shape: s32[256,4], index: 0, kind: input, shape index: {}]   ;;  %s2398_s1 = inlined_call_operand.vmem [shape: bf16[256,128], index: 1, kind: input, shape index: {}]   ;;  %s2399_s2 = inlined_call_operand.hbm [shape: bf16[256,128], index: 2, kind: output, shape index: {}]  }
   0x1   :  { %9 = vsyncpa [#allocation3 + $0x1], 0  ;;  %s1463_s9 = smov 0   ;;  %s1465_s10 = smov 0  }
   0x2   :  { %s1467_s11 = smov 0   ;;  %s1469_s12 = smov 0  }
   0x3 LB: > { %s1484_s13 = sadd.s32 4294967295, %s1438_s12   ;;  %s1042_s14 = sadd.s32 4294967294, %s1438_s12   ;;  %s1438_s12 = sphi %s1469_s12, %s2576_s12   ;;  %s1434_s11 = sphi %s1467_s11, %s2575_s11   ;;  %s1430_s10 = sphi %s1465_s10, %s2574_s10   ;;  %s1426_s9 = sphi %s1463_s9, %s2573_s9  }
   0x4   : > { %s1488_s15 = sadd.s32 1, %s1438_s12   ;;  %s69_s16 = sadd.s32 1, %s1434_s11 }
   0x5   : > { %s66_s17 = ssub.s32 %s1438_s12, %s1488_s15  ;;  %p79_p0 = scmp.ne.s32.totalorder %s1434_s11, %s1430_s10 }
   0x6   : > { %p67_p1 = scmp.eq.s32.totalorder %s66_s17, 0  ;;  %p80_p2 = scmp.eq.s32.totalorder %s1484_s13, 1 }
   0x7   : > { %p85_p3 = scmp.ne.s32.totalorder %s1430_s10, %s1426_s9  ;;  %p86_p4 = scmp.eq.s32.totalorder %s1042_s14, 1 }
   0x8   : > { %s1499_s18 = scalar_select %p67_p1, %s1434_s11, %s69_s16  }
   0x9   : > { %p1501_p5 = por %p80_p2, %p79_p0  ;;  %p1505_p6 = por %p86_p4, %p85_p3 }
   0xa   : > { %p1045_p7 = scmp.ge.s32.totalorder %s1438_s12, 1  ;;  %p116_p8 = scmp.lt.s32.totalorder %s1438_s12, 3 }
   0xc   : > { %p117_p9 = pnand %p1045_p7, %p116_p8 }
   0xd   : > { %s1047_s21 = sshll.u32 (!%p117_p9), %s1484_s13, 4  ;;  %v1440_v0 = vmov (!%p117_p9), 0   ;;  %v1441_v7 = vmov (!%p117_p9), 1   ;;  %v1442_v9 = vmov (!%p117_p9), 2   ;;  %v1443_v11 = vmov (!%p117_p9), 3   ;;  %v1360_v17 = vld [vmem:[%s2398_s1 + $0x40] sm:$0xff] (!%p117_p9)  }
   0xe   : > { %120 = sbr.rel (%p117_p9) target bundleno = 559 (0x22f), region = 28  ;;  %1341 = vset.pattern.permute.xlu1 (!%p117_p9), %v1440_v0  ;;  %1340 = vset.pattern.permute.xlu0 (!%p117_p9), %v1440_v0  ;;  %p139_p10 = scmp.lt.s32.totalorder (!%p117_p9), %s1047_s21, 31  ;;  %v1361_v18 = vld [vmem:[%s2398_s1] sm:$0xff] (!%p117_p9)   ;;  %v1362_v19 = vld [vmem:[%s2398_s1 + $0x48] sm:$0xff] (!%p117_p9)   ;;  %v1364_v22 = vld [vmem:[%s2398_s1 + $0x50] sm:$0xff] (!%p117_p9)   ;;  %v194_v59 = vlaneseq (!%p117_p9) }
   0xf   : > { %1214 = vmatprep.subr.bf16.mxu0 (!%p117_p9), %v1360_v17  ;;  %1278 = vmatprep.subr.bf16.mxu1 (!%p117_p9), %v1360_v17  ;;  %v1363_v21 = vld [vmem:[%s2398_s1 + $0x8] sm:$0xff] (!%p117_p9)   ;;  %v1365_v23 = vld [vmem:[%s2398_s1 + $0x10] sm:$0xff] (!%p117_p9)   ;;  %v1366_v24 = vld [vmem:[%s2398_s1 + $0x58] sm:$0xff] (!%p117_p9)   ;;  %s1166_s23 = sshll.u32 (!%p117_p9), %s1484_s13, 10  ;;  %s1445_s30 = smov (!%p117_p9), [#allocation2]  }
  0x10   : > { %1215 = vmatpush3.bf16.msra.mxu0 (!%p117_p9), %v1361_v18  ;;  %1286 = vmatpush3.bf16.msra.mxu1 (!%p117_p9), %v1361_v18  ;;  %v1367_v25 = vld [vmem:[%s2398_s1 + $0x18] sm:$0xff] (!%p117_p9)   ;;  %v1368_v26 = vld [vmem:[%s2398_s1 + $0x60] sm:$0xff] (!%p117_p9)   ;;  %v1370_v28 = vld [vmem:[%s2398_s1 + $0x68] sm:$0xff] (!%p117_p9)   ;;  %v1711_v62 = vand.u32 (!%p117_p9), 127, %v194_v59  ;;  %v2423_v18 = vmov (!%p117_p9), 0  ;;  %s2349_s28 = scalar_lea.hbm (!%p117_p9), %s2399_s2, %s1166_s23  ;;  %s1380_s3 = sshll.u32 (!%p117_p9), %s1445_s30, 4  ;;  %s1381_s3 = int_to_ptr.vmem [resolvable:$false] %s1380_s3 }
  0x11   : > { %1216 = vmatprep.subr.bf16.mxu0 (!%p117_p9), %v1362_v19  ;;  %1279 = vmatprep.subr.bf16.mxu1 (!%p117_p9), %v1362_v19  ;;  %v1369_v27 = vld [vmem:[%s2398_s1 + $0x20] sm:$0xff] (!%p117_p9)   ;;  %v1371_v29 = vld [vmem:[%s2398_s1 + $0x28] sm:$0xff] (!%p117_p9)   ;;  %v1372_v30 = vld [vmem:[%s2398_s1 + $0x70] sm:$0xff] (!%p117_p9)   ;;  %v2425_v19 = vmov (!%p117_p9), 0  ;;  %s1382_s4 = scalar_lea.vmem (!%p117_p9), %s1381_s3, 2048 }
  0x12   : > { %v1373_v31 = vld [vmem:[%s2398_s1 + $0x30] sm:$0xff] (!%p117_p9)   ;;  %v1374_v32 = vld [vmem:[%s2398_s1 + $0x78] sm:$0xff] (!%p117_p9)  }
  0x13   : > { %v1375_v33 = vld [vmem:[%s2398_s1 + $0x38] sm:$0xff] (!%p117_p9)  }
  0x14   : > { %1217 = vmatpush3.bf16.msra.mxu0 (!%p117_p9), %v1363_v21  ;;  %1287 = vmatpush3.bf16.msra.mxu1 (!%p117_p9), %v1363_v21 }
  0x15   : > { %s2578_s21 = smov (!%p139_p10, %s1047_s21), 31  ;;  %1218 = vmatprep.subr.bf16.mxu0 %v1364_v22  ;;  %1280 = vmatprep.subr.bf16.mxu1 %v1364_v22  ;;  %v2436_v22 = vmov 0 }
  0x16   : > { %s1048_s22 = sshll.u32 %s2578_s21, 3 }
  0x17   : > { %s1517_s25 = scalar_lea.vmem %s2397_s0, %s1048_s22 }
  0x18   : > { %v154_v1 = vld [vmem:[%s1517_s25 + $0x40] sm:$0xff]  ;;  %v1525_v3 = vld [vmem:[%s1517_s25 + $0x48] sm:$0xff]  ;;  %v1530_v5 = vld [vmem:[%s1517_s25 + $0x18] sm:$0xff]  ;;  %1219 = vmatpush3.bf16.msra.mxu0 %v1365_v23  ;;  %1288 = vmatpush3.bf16.msra.mxu1 %v1365_v23 }
  0x19   : > { %v1521_v2 = vld [vmem:[%s1517_s25] sm:$0xff]  ;;  %222 = vperm.xlu1 %1341, %v154_v1   ;;  %v147_v4 = vld [vmem:[%s1517_s25 + $0x8] sm:$0xff]  ;;  %v1539_v8 = vld [vmem:[%s1517_s25 + $0x38] sm:$0xff]  ;;  %1220 = vmatprep.subr.bf16.mxu0 %v1366_v24 }
  0x1a   : > { %198 = vperm.xlu0 %1340, %v1521_v2   ;;  %v1533_v6 = vld [vmem:[%s1517_s25 + $0x28] sm:$0xff]  ;;  %v1549_v10 = vld [vmem:[%s1517_s25 + $0x10] sm:$0xff]  ;;  %v1554_v12 = vld [vmem:[%s1517_s25 + $0x58] sm:$0xff]  ;;  %1281 = vmatprep.subr.bf16.mxu1 %v1366_v24  ;;  %v2438_v24 = vmov 0 }
  0x1b   : > { %v1558_v13 = vld [vmem:[%s1517_s25 + $0x20] sm:$0xff]  ;;  %v1562_v14 = vld [vmem:[%s1517_s25 + $0x68] sm:$0xff]  ;;  %v1568_v15 = vld [vmem:[%s1517_s25 + $0x50] sm:$0xff] }
  0x1c   : > { %v1571_v16 = vld [vmem:[%s1517_s25 + $0x30] sm:$0xff]  ;;  %v1585_v20 = vld [vmem:[%s1517_s25 + $0x78] sm:$0xff]  ;;  %1221 = vmatpush3.bf16.msra.mxu0 %v1367_v25  ;;  %1289 = vmatpush3.bf16.msra.mxu1 %v1367_v25  ;;  %v158_v34 = vld [vmem:[%s1517_s25 + $0x60] sm:$0xff] }
  0x1d   : > { %225 = vperm.xlu1 %1341, %v1525_v3   ;;  %1222 = vmatprep.subr.bf16.mxu0 %v1368_v26  ;;  %v160_v37 = vld [vmem:[%s1517_s25 + $0x70] sm:$0xff]  ;;  %s135_s25 = sand.u32 1, %s1430_s10  }
  0x1e   : > { %201 = vperm.xlu0 %1340, %v147_v4   ;;  %1282 = vmatprep.subr.bf16.mxu1 %v1368_v26  ;;  %v2444_v26 = vmov 0  ;;  %s1046_s21 = sshll.u32 %s135_s25, 6  ;;  %s2356_s29 = scalar_lea.sflag [#allocation3], %s135_s25 }
  0x1f   : > { %s2335_s22 = scalar_lea.vmem [#allocation2], %s1046_s21 }
  0x20   : > { %1223 = vmatpush3.bf16.msra.mxu0 %v1369_v27  ;;  %1290 = vmatpush3.bf16.msra.mxu1 %v1369_v27  ;;  %v2447_v27 = vmov 0  ;;  %s980_s24 = sshll.u32 %s2335_s22, 4  ;;  %s2351_s24 = int_to_ptr.vmem [resolvable:$true] %s980_s24 }
  0x21   : > { %1342 = vset.pattern.permute.xlu1 %v1441_v7  ;;  %1224 = vmatprep.subr.bf16.mxu0 %v1370_v28  ;;  %s1376_s13 = scalar_lea.vmem %s2351_s24, 1024  ;;  %p1383_p0 = scmp.lt.s32.totalorder %s2351_s24, %s1381_s3 }
  0x22   : > { %207 = vperm.xlu0 %1340, %v1530_v5   ;;  %281 = vperm.xlu1 %1342, %v147_v4   ;;  %p1377_p11 = scmp.ne.s32.totalorder %s2351_s24, %s1376_s13  ;;  %p1384_p1 = scmp.lt.s32.totalorder %s1382_s4, %s1376_s13 }
  0x23   : > { %1283 = vmatprep.subr.bf16.mxu1 %v1370_v28  ;;  %v2450_v28 = vmov 0 }
  0x24   : > { %1225 = vmatpush3.bf16.msra.mxu0 %v1371_v29  ;;  %1291 = vmatpush3.bf16.msra.mxu1 %v1371_v29  ;;  %v2454_v29 = vmov 0  ;;  %p1378_p12 = pnand %p1377_p11, %p1501_p5  ;;  %p1385_p2 = por %p1384_p1, %p1383_p0 }
  0x25   : > { %1226 = vmatprep.subr.bf16.mxu0 %v1372_v30  ;;  %1284 = vmatprep.subr.bf16.mxu1 %v1372_v30  ;;  %v2457_v30 = vmov 0 }
  0x26   : > { %213 = vperm.xlu0 %1340, %v1533_v6   ;;  %302 = vperm.xlu1 %1342, %v154_v1   ;;  %p1379_p13 = pneg %p1378_p12 }
  0x28   : > { %1227 = vmatpush3.bf16.msra.mxu0 %v1373_v31  ;;  %1292 = vmatpush3.bf16.msra.mxu1 %v1373_v31  ;;  %v2461_v31 = vmov 0  ;;  %p1386_p3 = pnand %p1385_p2, %p1379_p13 }
  0x29   : > { %1228 = vmatprep.subr.bf16.mxu0 %v1374_v32  ;;  %1285 = vmatprep.subr.bf16.mxu1 %v1374_v32  ;;  %v2464_v32 = vmov 0 }
  0x2a   : > { %219 = vperm.xlu0 %1340, %v1539_v8   ;;  %1343 = vset.pattern.permute.xlu1 %v1442_v9 }
  0x2b   : > { %390 = vperm.xlu1 %1343, %v1521_v2  }
  0x2c   : > { %1229 = vmatpush3.bf16.msra.mxu0 %v1375_v33  ;;  %1293 = vmatpush3.bf16.msra.mxu1 %v1375_v33  ;;  %v2466_v33 = vmov 0 }
  0x2e   : > { %1354 = vset.pattern.permute.xlu0 %v1441_v7 }
  0x2f   : > { %278 = vperm.xlu0 %1354, %v1521_v2   ;;  %414 = vperm.xlu1 %1343, %v154_v1  }
  0x33   : > { %305 = vperm.xlu0 %1354, %v1525_v3   ;;  %417 = vperm.xlu1 %1343, %v1525_v3  }
  0x37   : > { %284 = vperm.xlu0 %1354, %v1549_v10   ;;  %1344 = vset.pattern.permute.xlu1 %v1443_v11 }
  0x38   : > { %505 = vperm.xlu1 %1344, %v147_v4  }
  0x3b   : > { %311 = vperm.xlu0 %1354, %v1554_v12  }
  0x3c   : > { %526 = vperm.xlu1 %1344, %v154_v1   ;;  %v1716_v1 = vadd.s32 128, %v1711_v62 }
  0x3f   : > { %290 = vperm.xlu0 %1354, %v1558_v13  }
  0x40   : > { %1345 = vset.pattern.permute.xlu1 %v1440_v0 }
  0x41   : > { %204 = vperm.xlu1 %1345, %v1549_v10  }
  0x43   : > { %317 = vperm.xlu0 %1354, %v1562_v14  }
  0x45   : > { %228 = vperm.xlu1 %1345, %v1568_v15  }
  0x47   : > { %296 = vperm.xlu0 %1354, %v1571_v16  }
  0x49   : > { %231 = vperm.xlu1 %1345, %v1554_v12  }
  0x4b   : > { %323 = vperm.xlu0 %1354, %v1585_v20  }
  0x4d   : > { %1346 = vset.pattern.permute.xlu1 %v1441_v7 }
  0x4e   : > { %287 = vperm.xlu1 %1346, %v1530_v5  }
  0x4f   : > { %1356 = vset.pattern.permute.xlu0 %v1442_v9 }
  0x50   : > { %393 = vperm.xlu0 %1356, %v147_v4   ;;  %v2523_v4 = vmov 0 }
  0x52   : > { %308 = vperm.xlu1 %1346, %v1568_v15  }
  0x54   : > { %399 = vperm.xlu0 %1356, %v1530_v5  }
  0x56   : > { %1347 = vset.pattern.permute.xlu1 %v1442_v9 }
  0x57   : > { %396 = vperm.xlu1 %1347, %v1549_v10  }
  0x58   : > { %405 = vperm.xlu0 %1356, %v1533_v6  }
  0x5b   : > { %420 = vperm.xlu1 %1347, %v1568_v15  }
  0x5c   : > { %411 = vperm.xlu0 %1356, %v1539_v8  }
  0x5f   : > { %423 = vperm.xlu1 %1347, %v1554_v12  }
  0x60   : > { %1358 = vset.pattern.permute.xlu0 %v1443_v11 }
  0x61   : > { %502 = vperm.xlu0 %1358, %v1521_v2  }
  0x63   : > { %1348 = vset.pattern.permute.xlu1 %v1443_v11 }
  0x64   : > { %511 = vperm.xlu1 %1348, %v1530_v5   ;;  %v2525_v5 = vmov 0 }
  0x65   : > { %529 = vperm.xlu0 %1358, %v1525_v3  }
  0x68   : > { %532 = vperm.xlu1 %1348, %v1568_v15   ;;  %v2542_v15 = vmov 0 }
  0x69   : > { %508 = vperm.xlu0 %1358, %v1549_v10  }
  0x6c   : > { %1349 = vset.pattern.permute.xlu1 %v1440_v0 }
  0x6d   : > { %535 = vperm.xlu0 %1358, %v1554_v12   ;;  %210 = vperm.xlu1 %1349, %v1558_v13   ;;  %v2534_v12 = vmov 0 }
  0x71   : > { %514 = vperm.xlu0 %1358, %v1558_v13   ;;  %234 = vperm.xlu1 %1349, %v158_v34  }
  0x75   : > { %541 = vperm.xlu0 %1358, %v1562_v14   ;;  %237 = vperm.xlu1 %1349, %v1562_v14  }
  0x79   : > { %520 = vperm.xlu0 %1358, %v1571_v16   ;;  %1350 = vset.pattern.permute.xlu1 %v1441_v7 }
  0x7a   : > { %293 = vperm.xlu1 %1350, %v1533_v6  }
  0x7d   : > { %547 = vperm.xlu0 %1358, %v1585_v20  }
  0x7e   : > { %314 = vperm.xlu1 %1350, %v158_v34  }
  0x82   : > { %1351 = vset.pattern.permute.xlu1 %v1442_v9 }
  0x83   : > { %402 = vperm.xlu1 %1351, %v1558_v13  }
  0x87   : > { %426 = vperm.xlu1 %1351, %v158_v34  }
  0x8b   : > { %429 = vperm.xlu1 %1351, %v1562_v14  }
  0x8f   : > { %1352 = vset.pattern.permute.xlu1 %v1443_v11 }
  0x90   : > { %517 = vperm.xlu1 %1352, %v1533_v6  }
  0x94   : > { %538 = vperm.xlu1 %1352, %v158_v34  }
  0x98   : > { %v223_v35 = vpop.permute.xlu1 %222  ;;  %1353 = vset.pattern.permute.xlu1 %v1440_v0 }
  0x99   : > { %v1663_v36 = vpop.permute.xlu0 %198  ;;  %216 = vperm.xlu1 %1353, %v1571_v16   ;;  %vm261_vm3 = vcmp.eq.s32.totalorder %v1711_v62, %v223_v35  ;;  %vm262_vm10 = vcmp.eq.s32.totalorder %v1716_v1, %v223_v35 }
  0x9a   : > { %vm245_vm5 = vcmp.eq.s32.totalorder %v1711_v62, %v1663_v36  ;;  %vm246_vm11 = vcmp.eq.s32.totalorder %v1716_v1, %v1663_v36  ;;  %v2470_v36 = vmov 0 }
  0x9c   : > { %v1667_v38 = vpop.permute.xlu1 %225 }
  0x9d   : > { %v202_v39 = vpop.permute.xlu0 %201  ;;  %240 = vperm.xlu1 %1353, %v160_v37  }
  0x9e   : > { %vm247_vm0 = vcmp.eq.s32.totalorder %v1711_v62, %v202_v39  ;;  %vm248_vm6 = vcmp.eq.s32.totalorder %v1716_v1, %v202_v39  ;;  %v1444_v39 = vmov 1.0|1.0  }
  0xa1   : > { %v1669_v40 = vpop.permute.xlu0 %207  ;;  %v282_v41 = vpop.permute.xlu1 %281  ;;  %243 = vperm.xlu1 %1353, %v1585_v20  }
  0xa2   : > { %vm327_vm1 = vcmp.eq.s32.totalorder %v1711_v62, %v282_v41  ;;  %vm328_vm7 = vcmp.eq.s32.totalorder %v1716_v1, %v282_v41  ;;  %v2482_v41 = vmov 0 }
  0xa3   : > { %vm1731_vm8 = vmor %vm247_vm0, %vm327_vm1 }
  0xa4   : > { %vm1749_vm0 = vmor %vm248_vm6, %vm328_vm7  ;;  %vm264_vm6 = vcmp.eq.s32.totalorder %v1716_v1, %v1667_v38 }
  0xa5   : > { %v1672_v42 = vpop.permute.xlu0 %213  ;;  %v303_v43 = vpop.permute.xlu1 %302  ;;  %1355 = vset.pattern.permute.xlu1 %v1441_v7  ;;  %v2408_v7 = vmov 0 }
  0xa6   : > { %299 = vperm.xlu1 %1355, %v1539_v8   ;;  %vm341_vm2 = vcmp.eq.s32.totalorder %v1711_v62, %v303_v43  ;;  %vm342_vm4 = vcmp.eq.s32.totalorder %v1716_v1, %v303_v43  ;;  %v2409_v7 = vsel %vm1749_vm0, 4294967295, %v2408_v7  ;;  %v2485_v43 = vmov 0 }
  0xa7   : > { %vm1739_vm12 = vmor %vm261_vm3, %vm341_vm2  ;;  %vm263_vm3 = vcmp.eq.s32.totalorder %v1711_v62, %v1667_v38 }
  0xa8   : > { %vm1744_vm14 = vmor %vm262_vm10, %vm342_vm4 }
  0xa9   : > { %v1676_v44 = vpop.permute.xlu0 %219 }
  0xaa   : > { %320 = vperm.xlu1 %1355, %v160_v37   ;;  %v1678_v45 = vpop.permute.xlu1 %390 }
  0xab   : > { %vm438_vm10 = vcmp.eq.s32.totalorder %v1716_v1, %v1678_v45  ;;  %vm437_vm7 = vcmp.eq.s32.totalorder %v1711_v62, %v1678_v45 }
  0xae   : > { %v279_v46 = vpop.permute.xlu0 %278  ;;  %1357 = vset.pattern.permute.xlu1 %v1442_v9  ;;  %v1681_v47 = vpop.permute.xlu1 %414 }
  0xaf   : > { %408 = vperm.xlu1 %1357, %v1571_v16   ;;  %vm325_vm9 = vcmp.eq.s32.totalorder %v1711_v62, %v279_v46  ;;  %vm326_vm13 = vcmp.eq.s32.totalorder %v1716_v1, %v279_v46  ;;  %v2419_v16 = vmov 0 }
  0xb0   : > { %vm1753_vm1 = vmor %vm245_vm5, %vm325_vm9 }
  0xb1   : > { %vm358_vm4 = vmor %vm246_vm11, %vm326_vm13  ;;  %vm453_vm13 = vcmp.eq.s32.totalorder %v1711_v62, %v1681_v47 }
  0xb2   : > { %v306_v48 = vpop.permute.xlu0 %305  ;;  %v1684_v49 = vpop.permute.xlu1 %417 }
  0xb3   : > { %432 = vperm.xlu1 %1357, %v160_v37   ;;  %vm343_vm15 = vcmp.eq.s32.totalorder %v1711_v62, %v306_v48  ;;  %vm344_vm2 = vcmp.eq.s32.totalorder %v1716_v1, %v306_v48 }
  0xb4   : > { %vm1768_vm5 = vmor %vm263_vm3, %vm343_vm15  ;;  %vm2418_vm3 = vcmp.eq.s32.totalorder %v1716_v1, %v1681_v47  ;;  %v2489_v47 = vmov 0 }
  0xb5   : > { %vm1776_vm0 = vmor %vm264_vm6, %vm344_vm2 }
  0xb6   : > { %v1686_v50 = vpop.permute.xlu0 %284  ;;  %vm1793_vm2 = vmor %vm358_vm4, %vm438_vm10 }
  0xb7   : > { %435 = vperm.xlu1 %1357, %v1585_v20   ;;  %v1689_v51 = vpop.permute.xlu1 %505  ;;  %vm1807_vm9 = vmor %vm1744_vm14, %vm2418_vm3  ;;  %v2429_v20 = vmov 0 }
  0xb8   : > { %v2420_v16 = vsel %vm1807_vm9, 4294967295, %v2419_v16  ;;  %vm1821_vm6 = vmor %vm1753_vm1, %vm437_vm7  ;;  %vm2427_vm1 = vcmp.eq.s32.totalorder %v1716_v1, %v1686_v50 }
  0xb9   : > { %v2424_v18 = vsel %vm1821_vm6, 4294967295, %v2423_v18  ;;  %vm1827_vm14 = vmor %vm1739_vm12, %vm453_vm13  ;;  %vm2432_vm13 = vcmp.eq.s32.totalorder %v1711_v62, %v1669_v40  ;;  %vm2442_vm6 = vcmp.eq.s32.totalorder %v1711_v62, %v1686_v50 }
  0xba   : > { %v1691_v52 = vpop.permute.xlu0 %311  ;;  %v2426_v19 = vsel %vm1827_vm14, 4294967295, %v2425_v19 }
  0xbb   : > { %1359 = vset.pattern.permute.xlu1 %v1443_v11  ;;  %v1694_v53 = vpop.permute.xlu1 %526  ;;  %v2532_v11 = vmov 0 }
  0xbc   : > { %523 = vperm.xlu1 %1359, %v1539_v8  }
  0xbe   : > { %v1697_v54 = vpop.permute.xlu0 %290 }
  0xc0   : > { %544 = vperm.xlu1 %1359, %v160_v37   ;;  %v1699_v55 = vpop.permute.xlu1 %204  ;;  %v2473_v37 = vmov 0 }
  0xc1   : > { %vm2428_vm7 = vcmp.eq.s32.totalorder %v1716_v1, %v1699_v55  ;;  %vm2443_vm14 = vcmp.eq.s32.totalorder %v1711_v62, %v1699_v55 }
  0xc2   : > { %v1701_v56 = vpop.permute.xlu0 %317  ;;  %vm1843_vm4 = vmor %vm2428_vm7, %vm2427_vm1 }
  0xc3   : > { %v2430_v20 = vsel %vm1843_vm4, 4294967295, %v2429_v20  ;;  %vm2441_vm4 = vnez %v2409_v7 }
  0xc4   : > { %v1703_v57 = vpop.permute.xlu1 %228 }
  0xc5   : > { %vm265_vm7 = vcmp.eq.s32.totalorder %v1711_v62, %v1703_v57 }
  0xc6   : > { %v1705_v58 = vpop.permute.xlu0 %296 }
  0xc8   : > { %v1707_v60 = vpop.permute.xlu1 %231 }
  0xc9   : > { %vm2460_vm9 = vcmp.eq.s32.totalorder %v1711_v62, %v1707_v60 }
  0xca   : > { %v1709_v61 = vpop.permute.xlu0 %323 }
  0xcd   : > { %v288_v63 = vpop.permute.xlu1 %287 }
  0xce   : > { %vm332_vm15 = vcmp.eq.s32.totalorder %v1716_v1, %v288_v63  ;;  %vm2431_vm12 = vcmp.eq.s32.totalorder %v1711_v62, %v288_v63 }
  0xcf   : > { %v1713_v0 = vpop.permute.xlu0 %393  ;;  %vm1852_vm3 = vmor %vm2432_vm13, %vm2431_vm12  ;;  %vm2435_vm12 = vcmp.eq.s32.totalorder %v1716_v1, %v1669_v40  ;;  %v2479_v40 = vmov 0 }
  0xd0   : > { %vm439_vm11 = vcmp.eq.s32.totalorder %v1711_v62, %v1713_v0  ;;  %vm1869_vm13 = vmor %vm2435_vm12, %vm332_vm15  ;;  %vm2440_vm12 = vcmp.eq.s32.totalorder %v1716_v1, %v1713_v0 }
  0xd1   : > { %v1721_v2 = vpop.permute.xlu1 %308  ;;  %vm1815_vm10 = vmor %vm1731_vm8, %vm439_vm11  ;;  %vm551_vm8 = vcmp.eq.s32.totalorder %v1711_v62, %v1689_v51  ;;  %v2437_v22 = vsel %vm1869_vm13, 4294967295, %v2436_v22 }
  0xd2   : > { %vm1885_vm15 = vmor %vm1815_vm10, %vm551_vm8  ;;  %vm266_vm8 = vcmp.eq.s32.totalorder %v1716_v1, %v1703_v57  ;;  %vm2456_vm13 = vcmp.eq.s32.totalorder %v1716_v1, %v1721_v2  ;;  %v2510_v57 = vmov 0 }
  0xd3   : > { %v1725_v3 = vpop.permute.xlu0 %399  ;;  %v2439_v24 = vsel %vm1885_vm15, 4294967295, %v2438_v24  ;;  %vm472_vm11 = vmor %vm2441_vm4, %vm2440_vm12  ;;  %vm2446_vm15 = vcmp.eq.s32.totalorder %v1711_v62, %v1721_v2 }
  0xd4   : > { %vm1902_vm10 = vmor %vm2443_vm14, %vm2442_vm6  ;;  %vm443_vm12 = vcmp.eq.s32.totalorder %v1711_v62, %v1725_v3  ;;  %vm2449_vm6 = vcmp.eq.s32.totalorder %v1711_v62, %v1684_v49 }
  0xd5   : > { %v2445_v26 = vsel %vm1902_vm10, 4294967295, %v2444_v26  ;;  %vm1911_vm4 = vmor %vm265_vm7, %vm2446_vm15  ;;  %vm552_vm7 = vcmp.eq.s32.totalorder %v1716_v1, %v1689_v51  ;;  %vm2452_vm15 = vcmp.eq.s32.totalorder %v1716_v1, %v1691_v52  ;;  %vm2453_vm10 = vcmp.eq.s32.totalorder %v1716_v1, %v1707_v60 }
  0xd6   : > { %v1758_v9 = vpop.permute.xlu1 %396  ;;  %v2448_v27 = vsel %vm1911_vm4, 4294967295, %v2447_v27  ;;  %vm1923_vm14 = vmor %vm1768_vm5, %vm2449_vm6  ;;  %vm444_vm6 = vcmp.eq.s32.totalorder %v1716_v1, %v1725_v3  ;;  %v2501_v51 = vmov 0 }
  0xd7   : > { %v1760_v10 = vpop.permute.xlu0 %405  ;;  %v2451_v28 = vsel %vm1923_vm14, 4294967295, %v2450_v28  ;;  %vm1935_vm4 = vmor %vm2453_vm10, %vm2452_vm15  ;;  %vm2459_vm14 = vcmp.eq.s32.totalorder %v1711_v62, %v1691_v52  ;;  %v2505_v52 = vmov 0 }
  0xd8   : > { %v2455_v29 = vsel %vm1935_vm4, 4294967295, %v2454_v29  ;;  %vm1942_vm5 = vmor %vm266_vm8, %vm2456_vm13  ;;  %vm2463_vm13 = vcmp.eq.s32.totalorder %v1716_v1, %v1684_v49  ;;  %v2495_v49 = vmov 0 }
  0xd9   : > { %v2458_v30 = vsel %vm1942_vm5, 4294967295, %v2457_v30  ;;  %vm1954_vm10 = vmor %vm2460_vm9, %vm2459_vm14  ;;  %vm565_vm5 = vcmp.eq.s32.totalorder %v1711_v62, %v1694_v53 }
  0xda   : > { %v1789_v13 = vpop.permute.xlu1 %420  ;;  %v2462_v31 = vsel %vm1954_vm10, 4294967295, %v2461_v31  ;;  %vm584_vm4 = vmor %vm472_vm11, %vm552_vm7  ;;  %vm442_vm11 = vcmp.eq.s32.totalorder %v1716_v1, %v1758_v9  ;;  %vm2469_vm7 = vnez %v2420_v16 }
  0xdb   : > { %v1791_v14 = vpop.permute.xlu0 %411  ;;  %vm1964_vm8 = vmor %vm1776_vm0, %vm2463_vm13  ;;  %vm2468_vm0 = vcmp.eq.s32.totalorder %v1716_v1, %v1694_v53 }
  0xdc   : > { %v2465_v32 = vsel %vm1964_vm8, 4294967295, %v2464_v32  ;;  %vm1972_vm9 = vmor %vm1852_vm3, %vm443_vm12  ;;  %vm2472_vm3 = vnez %v2437_v22 }
  0xdd   : > { %v2467_v33 = vsel %vm1972_vm9, 4294967295, %v2466_v33  ;;  %vm1985_vm13 = vmor %vm2469_vm7, %vm2468_vm0  ;;  %vm457_vm9 = vcmp.eq.s32.totalorder %v1711_v62, %v1789_v13  ;;  %vm2478_vm0 = vnez %v2426_v19 }
  0xde   : > { %v424_v23 = vpop.permute.xlu1 %423  ;;  %v2471_v36 = vsel %vm1985_vm13, 4294967295, %v2470_v36  ;;  %vm1991_vm12 = vmor %vm2472_vm3, %vm444_vm6  ;;  %vm441_vm6 = vcmp.eq.s32.totalorder %v1711_v62, %v1758_v9  ;;  %vm2484_vm3 = vnez %v2448_v27  ;;  %vm2494_vm13 = vnez %v2455_v29 }
  0xdf   : > { %v2474_v37 = vsel %vm1991_vm12, 4294967295, %v2473_v37  ;;  %vm2006_vm7 = vmor %vm2478_vm0, %vm565_vm5  ;;  %vm460_vm5 = vcmp.eq.s32.totalorder %v1716_v1, %v424_v23  ;;  %v2558_v29 = vmov 0 }
  0xe0   : > { %v503_v25 = vpop.permute.xlu0 %502  ;;  %v2480_v40 = vsel %vm2006_vm7, 4294967295, %v2479_v40  ;;  %vm2050_vm10 = vmor %vm2494_vm13, %vm460_vm5  ;;  %vm2503_vm13 = vnez %v2465_v32 }
  0xe1   : > { %vm550_vm1 = vcmp.eq.s32.totalorder %v1716_v1, %v503_v25  ;;  %vm549_vm15 = vcmp.eq.s32.totalorder %v1711_v62, %v503_v25  ;;  %v2496_v49 = vsel %vm2050_vm10, 4294967295, %v2495_v49  ;;  %vm2504_vm10 = vnez %v2467_v33 }
  0xe2   : > { %vm582_vm14 = vmor %vm1793_vm2, %vm550_vm1  ;;  %vm2475_vm1 = vnez %v2424_v18  ;;  %v2552_v25 = vmov 0 }
  0xe3   : > { %v512_v34 = vpop.permute.xlu1 %511  ;;  %vm1097_vm2 = vmpackc.low %vm584_vm4, %vm582_vm14  ;;  %vm2481_vm4 = vnez %v2430_v20 }
  0xe4   : > { %v530_v35 = vpop.permute.xlu0 %529  ;;  %vm1999_vm8 = vmor %vm2475_vm1, %vm549_vm15  ;;  %1098 = vmatprep.mubr.msk.bf16.mxu0 %vm1097_vm2, %v1444_v39  ;;  %vm458_vm15 = vcmp.eq.s32.totalorder %v1716_v1, %v1789_v13  ;;  %vm555_vm12 = vcmp.eq.s32.totalorder %v1711_v62, %v512_v34 }
  0xe5   : > { %vm2014_vm14 = vmor %vm2481_vm4, %vm442_vm11  ;;  %vm567_vm1 = vcmp.eq.s32.totalorder %v1711_v62, %v530_v35  ;;  %vm459_vm11 = vcmp.eq.s32.totalorder %v1711_v62, %v424_v23  ;;  %vm568_vm0 = vcmp.eq.s32.totalorder %v1716_v1, %v530_v35  ;;  %vm2487_vm4 = vnez %v2439_v24 }
  0xe6   : > { %v2483_v41 = vsel %vm2014_vm14, 4294967295, %v2482_v41  ;;  %vm2022_vm2 = vmor %vm2484_vm3, %vm457_vm9  ;;  %vm2488_vm9 = vnez %v2445_v26  ;;  %vm2491_vm14 = vnez %v2458_v30  ;;  %v2550_v24 = vmov 0 }
  0xe7   : > { %v2486_v43 = vsel %vm2022_vm2, 4294967295, %v2485_v43  ;;  %v533_v45 = vpop.permute.xlu1 %532  ;;  %vm1099_vm7 = vmpackc.low %vm2487_vm4, %vm1999_vm8  ;;  %vm556_vm8 = vcmp.eq.s32.totalorder %v1716_v1, %v512_v34  ;;  %v2554_v26 = vmov 0 }
  0xe8   : > { %v509_v46 = vpop.permute.xlu0 %508  ;;  %vm2036_vm3 = vmor %vm2488_vm9, %vm441_vm6  ;;  %1100 = vmatmul.mubr.msk.bf16.vlgmr.msra.gmra.mrb[0].mxu0 %vm1099_vm7, %v1444_v39  ;;  %vm2497_vm6 = vnez %v2451_v28  ;;  %vm569_vm7 = vcmp.eq.s32.totalorder %v1711_v62, %v533_v45 }
  0xe9   : > { %v2490_v47 = vsel %vm2036_vm3, 4294967295, %v2489_v47  ;;  %vm2042_vm2 = vmor %vm2491_vm14, %vm458_vm15  ;;  %vm2500_vm14 = vnez %v2462_v31  ;;  %vm554_vm9 = vcmp.eq.s32.totalorder %v1716_v1, %v509_v46 }
  0xea   : > { %vm2057_vm4 = vmor %vm2497_vm6, %vm567_vm1  ;;  %vm2507_vm1 = vnez %v2471_v36 }
  0xeb   : > { %vm2063_vm15 = vmor %vm2500_vm14, %vm459_vm11  ;;  %vm2508_vm11 = vnez %v2474_v37 }
  0xec   : > { %v2502_v51 = vsel %vm2063_vm15, 4294967295, %v2501_v51  ;;  %vm600_vm5 = vmor %vm2503_vm13, %vm568_vm0  ;;  %v211_v53 = vpop.permute.xlu1 %210  ;;  %v536_v55 = vpop.permute.xlu0 %535  ;;  %vm570_vm0 = vcmp.eq.s32.totalorder %v1716_v1, %v533_v45  ;;  %vm2509_vm13 = vnez %v2486_v43 }
  0xed   : > { %vm2073_vm3 = vmor %vm2504_vm10, %vm555_vm12  ;;  %vm2512_vm10 = vnez %v2483_v41 }
  0xee   : > { %v2506_v52 = vsel %vm2073_vm3, 4294967295, %v2505_v52  ;;  %vm1113_vm6 = vmpackc.low %vm600_vm5, %vm2507_vm1  ;;  %vm553_vm5 = vcmp.eq.s32.totalorder %v1711_v62, %v509_v46  ;;  %vm2513_vm1 = vnez %v2480_v40 }
  0xef   : > { %vm588_vm14 = vmor %vm2508_vm11, %vm556_vm8  ;;  %1114 = vmatprep.mubr.msk.bf16.mxu1 %vm1113_vm6, %v1444_v39  ;;  %vm572_vm11 = vcmp.eq.s32.totalorder %v1716_v1, %v536_v55 }
  0xf0   : > { %vm2085_vm15 = vmor %vm2509_vm13, %vm569_vm7  ;;  %v235_v59 = vpop.permute.xlu1 %234  ;;  %vm2514_vm13 = vnez %v2490_v47 }
  0xf1   : > { %v2511_v57 = vsel %vm2085_vm15, 4294967295, %v2510_v57  ;;  %vm586_vm12 = vmor %vm2512_vm10, %vm554_vm9  ;;  %vm571_vm9 = vcmp.eq.s32.totalorder %v1711_v62, %v536_v55  ;;  %vm2515_vm15 = vnez %v2496_v49 }
  0xf2   : > { %vm1115_vm8 = vmpackc.low %vm2057_vm4, %vm2513_vm1  ;;  %vm2516_vm4 = vnez %v2502_v51 }
  0xf3   : > { %1116 = vmatmul.mubr.msk.bf16.vlgmr.msra.gmra.mrb[0].mxu1 %vm1115_vm8, %v1444_v39  ;;  %vm1101_vm6 = vmpackc.low %vm588_vm14, %vm586_vm12  ;;  %vm2517_vm14 = vnez %v2506_v52 }
  0xf4   : > { %vm602_vm7 = vmor %vm2042_vm2, %vm570_vm0  ;;  %1102 = vmatprep.mubr.msk.bf16.mxu0 %vm1101_vm6, %v1444_v39  ;;  %v238_v60 = vpop.permute.xlu1 %237  ;;  %vm2518_vm0 = vnez %v2511_v57  ;;  %vm334_vm6 = vcmp.eq.s32.totalorder %v1716_v1, %v1697_v54 }
  0xf5   : > { %vm585_vm10 = vmor %vm2514_vm13, %vm553_vm5  ;;  %vm253_vm5 = vcmp.eq.s32.totalorder %v1711_v62, %v211_v53  ;;  %vm351_vm13 = vcmp.eq.s32.totalorder %v1711_v62, %v1701_v56 }
  0xf6   : > { %vm604_vm3 = vmor %vm2515_vm15, %vm572_vm11  ;;  %vm333_vm15 = vcmp.eq.s32.totalorder %v1711_v62, %v1697_v54  ;;  %vm254_vm11 = vcmp.eq.s32.totalorder %v1716_v1, %v211_v53 }
  0xf7   : > { %vm603_vm1 = vmor %vm2516_vm4, %vm571_vm9  ;;  %vm272_vm9 = vcmp.eq.s32.totalorder %v1716_v1, %v238_v60 }
  0xf8   : > { %vm1103_vm12 = vmpackc.low %vm2517_vm14, %vm585_vm10 }
  0xf9   : > { %1104 = vmatmul.mubr.msk.bf16.gmra.mrb[4].mxu0 %vm1103_vm12, %v1444_v39  ;;  %vm1117_vm2 = vmpackc.low %vm604_vm3, %vm602_vm7  ;;  %v294_v63 = vpop.permute.xlu1 %293  ;;  %vm271_vm3 = vcmp.eq.s32.totalorder %v1711_v62, %v238_v60 }
  0xfa   : > { %1118 = vmatprep.mubr.msk.bf16.mxu1 %vm1117_vm2, %v1444_v39  ;;  %vm1119_vm8 = vmpackc.low %vm603_vm1, %vm2518_vm0  ;;  %vm335_vm4 = vcmp.eq.s32.totalorder %v1711_v62, %v294_v63  ;;  %vm352_vm1 = vcmp.eq.s32.totalorder %v1716_v1, %v1701_v56  ;;  %vm336_vm12 = vcmp.eq.s32.totalorder %v1716_v1, %v294_v63  ;;  %vm255_vm2 = vcmp.eq.s32.totalorder %v1711_v62, %v1672_v42  ;;  %v515_v56 = vpop.permute.xlu0 %514 }
  0xfb   : > { %1120 = vmatmul.mubr.msk.bf16.gmra.mrb[4].mxu1 %vm1119_vm8, %v1444_v39  ;;  %vm2122_vm7 = vmor %vm253_vm5, %vm333_vm15  ;;  %vm256_vm15 = vcmp.eq.s32.totalorder %v1716_v1, %v1672_v42  ;;  %vm447_vm5 = vcmp.eq.s32.totalorder %v1711_v62, %v1760_v10  ;;  %v2527_v42 = vmov 0 }
  0xfc   : > { %vm2129_vm10 = vmor %vm254_vm11, %vm334_vm6 }
  0xfd   : > { %v315_v0 = vpop.permute.xlu1 %314  ;;  %vm2136_vm14 = vmor %vm271_vm3, %vm351_vm13  ;;  %vm558_vm3 = vcmp.eq.s32.totalorder %v1716_v1, %v515_v56 }
  0xfe   : > { %v2524_v4 = vsel %vm2136_vm14, 4294967295, %v2523_v4  ;;  %vm2143_vm0 = vmor %vm272_vm9, %vm352_vm1  ;;  %vm349_vm9 = vcmp.eq.s32.totalorder %v1711_v62, %v315_v0  ;;  %vm350_vm1 = vcmp.eq.s32.totalorder %v1716_v1, %v315_v0  ;;  %vm269_vm14 = vcmp.eq.s32.totalorder %v1711_v62, %v235_v59  ;;  %v542_v7 = vpop.permute.xlu0 %541 }
  0xff   : > { %v2526_v5 = vsel %vm2143_vm0, 4294967295, %v2525_v5  ;;  %vm367_vm6 = vmor %vm255_vm2, %vm335_vm4  ;;  %vm557_vm2 = vcmp.eq.s32.totalorder %v1711_v62, %v515_v56 }
 0x100   : > { %vm368_vm13 = vmor %vm256_vm15, %vm336_vm12  ;;  %vm270_vm15 = vcmp.eq.s32.totalorder %v1716_v1, %v235_v59 }
 0x101   : > { %vm2164_vm12 = vmor %vm367_vm6, %vm447_vm5 }
 0x102   : > { %v403_v54 = vpop.permute.xlu1 %402  ;;  %v2528_v42 = vsel %vm2164_vm12, 4294967295, %v2527_v42  ;;  %vm382_vm5 = vmor %vm270_vm15, %vm350_vm1  ;;  %vm2538_vm1 = vnez %v2524_v4  ;;  %vm576_vm15 = vcmp.eq.s32.totalorder %v1716_v1, %v542_v7 }
 0x103   : > { %vm445_vm8 = vcmp.eq.s32.totalorder %v1711_v62, %v403_v54  ;;  %vm446_vm11 = vcmp.eq.s32.totalorder %v1716_v1, %v403_v54 }
 0x104   : > { %vm477_vm0 = vmor %vm2122_vm7, %vm445_vm8 }
 0x105   : > { %vm478_vm4 = vmor %vm2129_vm10, %vm446_vm11  ;;  %vm2529_vm10 = vcmp.eq.s32.totalorder %v1716_v1, %v1760_v10 }
 0x106   : > { %v427_v6 = vpop.permute.xlu1 %426  ;;  %vm381_vm7 = vmor %vm269_vm14, %vm349_vm9 }
 0x107   : > { %vm461_vm8 = vcmp.eq.s32.totalorder %v1711_v62, %v427_v6  ;;  %vm2173_vm11 = vmor %vm368_vm13, %vm2529_vm10  ;;  %vm462_vm14 = vcmp.eq.s32.totalorder %v1716_v1, %v427_v6 }
 0x108   : > { %vm2177_vm6 = vmor %vm477_vm0, %vm557_vm2  ;;  %vm575_vm2 = vcmp.eq.s32.totalorder %v1711_v62, %v542_v7 }
 0x109   : > { %v2533_v11 = vsel %vm2177_vm6, 4294967295, %v2532_v11  ;;  %vm2181_vm12 = vmor %vm478_vm4, %vm558_vm3  ;;  %vm2539_vm3 = vnez %v2526_v5 }
 0x10a   : > { %v430_v9 = vpop.permute.xlu1 %429  ;;  %v2535_v12 = vsel %vm2181_vm12, 4294967295, %v2534_v12  ;;  %vm2188_vm13 = vmor %vm381_vm7, %vm461_vm8 }
 0x10b   : > { %vm463_vm9 = vcmp.eq.s32.totalorder %v1711_v62, %v430_v9  ;;  %vm464_vm10 = vcmp.eq.s32.totalorder %v1716_v1, %v430_v9  ;;  %vm2198_vm6 = vmor %vm382_vm5, %vm462_vm14  ;;  %vm2547_vm14 = vnez %v2535_v12 }
 0x10c   : > { %vm495_vm0 = vmor %vm2538_vm1, %vm463_vm9 }
 0x10d   : > { %vm496_vm4 = vmor %vm2539_vm3, %vm464_vm10  ;;  %vm2546_vm10 = vnez %v2528_v42 }
 0x10e   : > { %vm2202_vm12 = vmor %vm495_vm0, %vm575_vm2 }
 0x10f   : > { %v2543_v15 = vsel %vm2202_vm12, 4294967295, %v2542_v15  ;;  %v518_v16 = vpop.permute.xlu1 %517  ;;  %vm2206_vm7 = vmor %vm496_vm4, %vm576_vm15  ;;  %vm2548_vm4 = vnez %v2533_v11 }
 0x110   : > { %vm559_vm8 = vcmp.eq.s32.totalorder %v1711_v62, %v518_v16  ;;  %vm560_vm9 = vcmp.eq.s32.totalorder %v1716_v1, %v518_v16 }
 0x111   : > { %vm591_vm1 = vmor %vm2546_vm10, %vm559_vm8 }
 0x112   : > { %vm592_vm5 = vmor %vm2173_vm11, %vm560_vm9  ;;  %vm2549_vm9 = vnez %v2543_v15 }
 0x113   : > { %v539_v18 = vpop.permute.xlu1 %538  ;;  %vm1105_vm0 = vmpackc.low %vm592_vm5, %vm2547_vm14  ;;  %vm451_vm14 = vcmp.eq.s32.totalorder %v1711_v62, %v1791_v14 }
 0x114   : > { %vm573_vm2 = vcmp.eq.s32.totalorder %v1711_v62, %v539_v18  ;;  %vm574_vm3 = vcmp.eq.s32.totalorder %v1716_v1, %v539_v18  ;;  %1106 = vmatprep.mubr.msk.bf16.mxu0 %vm1105_vm0, %v1444_v39  ;;  %vm1107_vm15 = vmpackc.low %vm591_vm1, %vm2548_vm4  ;;  %vm452_vm0 = vcmp.eq.s32.totalorder %v1716_v1, %v1791_v14  ;;  %v521_v14 = vpop.permute.xlu0 %520 }
 0x115   : > { %vm605_vm12 = vmor %vm2188_vm13, %vm573_vm2  ;;  %1108 = vmatmul.mubr.msk.bf16.gmra.mrb[8].mxu0 %vm1107_vm15, %v1444_v39  ;;  %vm259_vm13 = vcmp.eq.s32.totalorder %v1711_v62, %v1676_v44 }
 0x116   : > { %vm606_vm11 = vmor %vm2198_vm6, %vm574_vm3 }
 0x117   : > { %vm1121_vm8 = vmpackc.low %vm2206_vm7, %vm606_vm11  ;;  %vm260_vm7 = vcmp.eq.s32.totalorder %v1716_v1, %v1676_v44  ;;  %vm337_vm11 = vcmp.eq.s32.totalorder %v1711_v62, %v1705_v58 }
 0x118   : > { %1122 = vmatprep.mubr.msk.bf16.mxu1 %vm1121_vm8, %v1444_v39  ;;  %v217_v19 = vpop.permute.xlu1 %216  ;;  %vm1123_vm10 = vmpackc.low %vm2549_vm9, %vm605_vm12  ;;  %vm338_vm9 = vcmp.eq.s32.totalorder %v1716_v1, %v1705_v58  ;;  %v2556_v58 = vmov 0  ;;  %v548_v28 = vpop.permute.xlu0 %547 }
 0x119   : > { %1124 = vmatmul.mubr.msk.bf16.gmra.mrb[8].mxu1 %vm1123_vm10, %v1444_v39  ;;  %vm257_vm4 = vcmp.eq.s32.totalorder %v1711_v62, %v217_v19  ;;  %vm258_vm15 = vcmp.eq.s32.totalorder %v1716_v1, %v217_v19 }
 0x11a   : > { %vm369_vm10 = vmor %vm257_vm4, %vm337_vm11 }
 0x11c   : > { %v241_v20 = vpop.permute.xlu1 %240 }
 0x120   : > { %v244_v21 = vpop.permute.xlu1 %243 }
 0x121   : > { %vm275_vm8 = vcmp.eq.s32.totalorder %v1711_v62, %v244_v21 }
 0x125   : > { %v300_v22 = vpop.permute.xlu1 %299 }
 0x126   : > { %vm339_vm1 = vcmp.eq.s32.totalorder %v1711_v62, %v300_v22  ;;  %vm340_vm6 = vcmp.eq.s32.totalorder %v1716_v1, %v300_v22 }
 0x127   : > { %vm371_vm5 = vmor %vm259_vm13, %vm339_vm1  ;;  %vm276_vm13 = vcmp.eq.s32.totalorder %v1716_v1, %v244_v21  ;;  %vm355_vm1 = vcmp.eq.s32.totalorder %v1711_v62, %v1709_v61 }
 0x128   : > { %vm372_vm12 = vmor %vm260_vm7, %vm340_vm6 }
 0x129   : > { %v321_v23 = vpop.permute.xlu1 %320  ;;  %vm2244_vm2 = vmor %vm371_vm5, %vm451_vm14  ;;  %vm356_vm5 = vcmp.eq.s32.totalorder %v1716_v1, %v1709_v61 }
 0x12a   : > { %v2551_v24 = vsel %vm2244_vm2, 4294967295, %v2550_v24  ;;  %vm2248_vm3 = vmor %vm372_vm12, %vm452_vm0  ;;  %vm353_vm4 = vcmp.eq.s32.totalorder %v1711_v62, %v321_v23 }
 0x12b   : > { %v2553_v25 = vsel %vm2248_vm3, 4294967295, %v2552_v25  ;;  %vm370_vm6 = vmor %vm258_vm15, %vm338_vm9  ;;  %vm354_vm15 = vcmp.eq.s32.totalorder %v1716_v1, %v321_v23  ;;  %vm273_vm9 = vcmp.eq.s32.totalorder %v1711_v62, %v241_v20 }
 0x12c   : > { %vm2265_vm14 = vmor %vm275_vm8, %vm355_vm1  ;;  %vm274_vm8 = vcmp.eq.s32.totalorder %v1716_v1, %v241_v20 }
 0x12d   : > { %v2555_v26 = vsel %vm2265_vm14, 4294967295, %v2554_v26  ;;  %vm2270_vm0 = vmor %vm276_vm13, %vm356_vm5  ;;  %vm561_vm14 = vcmp.eq.s32.totalorder %v1711_v62, %v521_v14  ;;  %vm562_vm13 = vcmp.eq.s32.totalorder %v1716_v1, %v521_v14 }
 0x12e   : > { %v409_v44 = vpop.permute.xlu1 %408  ;;  %v2557_v58 = vsel %vm2270_vm0, 4294967295, %v2556_v58  ;;  %vm385_vm1 = vmor %vm273_vm9, %vm353_vm4  ;;  %vm2562_vm4 = vnez %v2555_v26 }
 0x12f   : > { %vm449_vm7 = vcmp.eq.s32.totalorder %v1711_v62, %v409_v44  ;;  %vm450_vm12 = vcmp.eq.s32.totalorder %v1716_v1, %v409_v44  ;;  %vm386_vm5 = vmor %vm274_vm8, %vm354_vm15 }
 0x130   : > { %vm481_vm11 = vmor %vm369_vm10, %vm449_vm7 }
 0x131   : > { %vm482_vm3 = vmor %vm370_vm6, %vm450_vm12 }
 0x132   : > { %v433_v27 = vpop.permute.xlu1 %432  ;;  %vm2281_vm0 = vmor %vm481_vm11, %vm561_vm14  ;;  %vm2565_vm14 = vnez %v2557_v58 }
 0x133   : > { %vm465_vm2 = vcmp.eq.s32.totalorder %v1711_v62, %v433_v27  ;;  %v2559_v29 = vsel %vm2281_vm0, 4294967295, %v2558_v29  ;;  %vm2285_vm10 = vmor %vm482_vm3, %vm562_vm13  ;;  %vm466_vm6 = vcmp.eq.s32.totalorder %v1716_v1, %v433_v27  ;;  %vm579_vm3 = vcmp.eq.s32.totalorder %v1711_v62, %v548_v28 }
 0x134   : > { %vm2294_vm15 = vmor %vm385_vm1, %vm465_vm2  ;;  %vm580_vm13 = vcmp.eq.s32.totalorder %v1716_v1, %v548_v28 }
 0x135   : > { %vm2301_vm8 = vmor %vm386_vm5, %vm466_vm6  ;;  %vm2571_vm5 = vnez %v2553_v25 }
 0x136   : > { %v436_v61 = vpop.permute.xlu1 %435 }
 0x137   : > { %vm467_vm7 = vcmp.eq.s32.totalorder %v1711_v62, %v436_v61  ;;  %vm468_vm12 = vcmp.eq.s32.totalorder %v1716_v1, %v436_v61 }
 0x138   : > { %vm499_vm9 = vmor %vm2562_vm4, %vm467_vm7 }
 0x139   : > { %vm500_vm11 = vmor %vm2565_vm14, %vm468_vm12  ;;  %vm2570_vm12 = vnez %v2551_v24 }
 0x13a   : > { %vm2306_vm0 = vmor %vm499_vm9, %vm579_vm3 }
 0x13b   : > { %v524_v33 = vpop.permute.xlu1 %523  ;;  %vm612_vm7 = vmor %vm500_vm11, %vm580_vm13  ;;  %vm2572_vm11 = vnez %v2559_v29 }
 0x13c   : > { %vm563_vm2 = vcmp.eq.s32.totalorder %v1711_v62, %v524_v33  ;;  %vm564_vm1 = vcmp.eq.s32.totalorder %v1716_v1, %v524_v33 }
 0x13d   : > { %vm595_vm4 = vmor %vm2570_vm12, %vm563_vm2 }
 0x13e   : > { %vm596_vm6 = vmor %vm2571_vm5, %vm564_vm1 }
 0x13f   : > { %v545_v35 = vpop.permute.xlu1 %544  ;;  %vm1109_vm14 = vmpackc.low %vm596_vm6, %vm2285_vm10 }
 0x140   : > { %vm577_vm9 = vcmp.eq.s32.totalorder %v1711_v62, %v545_v35  ;;  %vm578_vm3 = vcmp.eq.s32.totalorder %v1716_v1, %v545_v35  ;;  %1110 = vmatprep.mubr.msk.bf16.mxu0 %vm1109_vm14, %v1444_v39  ;;  %vm1111_vm13 = vmpackc.low %vm595_vm4, %vm2572_vm11 }
 0x141   : > { %vm609_vm2 = vmor %vm2294_vm15, %vm577_vm9  ;;  %1112 = vmatmul.mubr.msk.bf16.gmra.mrb[12].mxu0 %vm1111_vm13, %v1444_v39 }
 0x142   : > { %vm610_vm1 = vmor %vm2301_vm8, %vm578_vm3 }
 0x143   : > { %vm1125_vm12 = vmpackc.low %vm612_vm7, %vm610_vm1 }
 0x144   : > { %vm1127_vm10 = vmpackc.low %vm2306_vm0, %vm609_vm2  ;;  %1126 = vmatprep.mubr.msk.bf16.mxu1 %vm1125_vm12, %v1444_v39 }
 0x145   : > { %1128 = vmatmul.mubr.msk.bf16.gmra.mrb[12].mxu1 %vm1127_vm10, %v1444_v39 }
 0x1bb   : > { %v1230_v62 = vpop.f32.mrb[0].mxu0 }
 0x1bc   : > { %v1231_v1 = vpop.f32.mrb[1].mxu0 }
 0x1bd   : > { %v1232_v36 = vadd.f32 %v1231_v1, %v1230_v62  ;;  %v1233_v37 = vpop.f32.mrb[2].mxu0 }
 0x1be   : > { %v1234_v38 = vpop.f32.mrb[3].mxu0 }
 0x1bf   : > { %v1235_v40 = vadd.f32 %v1234_v38, %v1233_v37 }
 0x1c1   : > { %v1170_v41 = vpack.c.bf16 %v1235_v40, %v1232_v36 }
 0x1c3   : > { %1171 = vst [vmem:[%s2335_s22] sm:$0xff] %v1170_v41  }
 0x1c6   : > { %v1254_v43 = vpop.f32.mrb[0].mxu1 }
 0x1c7   : > { %v1255_v45 = vpop.f32.mrb[1].mxu1 }
 0x1c8   : > { %v1256_v46 = vadd.f32 %v1255_v45, %v1254_v43  ;;  %v1257_v47 = vpop.f32.mrb[2].mxu1 }
 0x1c9   : > { %v1258_v39 = vpop.f32.mrb[3].mxu1 }
 0x1ca   : > { %v1259_v48 = vadd.f32 %v1258_v39, %v1257_v47 }
 0x1cc   : > { %v1190_v49 = vpack.c.bf16 %v1259_v48, %v1256_v46  ;;  %v1236_v50 = vpop.f32.mrb[4].mxu0 }
 0x1cd   : > { %v1237_v51 = vpop.f32.mrb[5].mxu0 }
 0x1ce   : > { %1210 = vst [vmem:[%s2335_s22 + $0x20] sm:$0xff] %v1190_v49   ;;  %v1238_v52 = vadd.f32 %v1237_v51, %v1236_v50  ;;  %v1239_v53 = vpop.f32.mrb[6].mxu0  ;;  %v1260_v55 = vpop.f32.mrb[4].mxu1 }
 0x1cf   : > { %v1240_v57 = vpop.f32.mrb[7].mxu0  ;;  %v1261_v59 = vpop.f32.mrb[5].mxu1 }
 0x1d0   : > { %v1241_v60 = vadd.f32 %v1240_v57, %v1239_v53  ;;  %v1262_v63 = vadd.f32 %v1261_v59, %v1260_v55  ;;  %v1263_v0 = vpop.f32.mrb[6].mxu1 }
 0x1d1   : > { %v1264_v2 = vpop.f32.mrb[7].mxu1 }
 0x1d2   : > { %v1175_v3 = vpack.c.bf16 %v1241_v60, %v1238_v52  ;;  %v1265_v54 = vadd.f32 %v1264_v2, %v1263_v0 }
 0x1d4   : > { %1207 = vst [vmem:[%s2335_s22 + $0x8] sm:$0xff] %v1175_v3   ;;  %v1195_v4 = vpack.c.bf16 %v1265_v54, %v1262_v63 }
 0x1d6   : > { %1211 = vst [vmem:[%s2335_s22 + $0x28] sm:$0xff] %v1195_v4  }
 0x1e8   : > { %v1242_v5 = vpop.f32.mrb[8].mxu0 }
 0x1e9   : > { %v1243_v56 = vpop.f32.mrb[9].mxu0 }
 0x1ea   : > { %v1244_v6 = vadd.f32 %v1243_v56, %v1242_v5  ;;  %v1245_v42 = vpop.f32.mrb[10].mxu0 }
 0x1eb   : > { %v1246_v7 = vpop.f32.mrb[11].mxu0 }
 0x1ec   : > { %v1247_v8 = vadd.f32 %v1246_v7, %v1245_v42  ;;  %v1266_v9 = vpop.f32.mrb[8].mxu1 }
 0x1ed   : > { %v1267_v11 = vpop.f32.mrb[9].mxu1 }
 0x1ee   : > { %v1180_v12 = vpack.c.bf16 %v1247_v8, %v1244_v6  ;;  %v1268_v10 = vadd.f32 %v1267_v11, %v1266_v9  ;;  %v1269_v13 = vpop.f32.mrb[10].mxu1 }
 0x1ef   : > { %v1270_v15 = vpop.f32.mrb[11].mxu1 }
 0x1f0   : > { %1208 = vst [vmem:[%s2335_s22 + $0x10] sm:$0xff] %v1180_v12   ;;  %v1271_v16 = vadd.f32 %v1270_v15, %v1269_v13 }
 0x1f2   : > { %v1200_v17 = vpack.c.bf16 %v1271_v16, %v1268_v10 }
 0x1f4   : > { %1212 = vst [vmem:[%s2335_s22 + $0x30] sm:$0xff] %v1200_v17  }
 0x214   : > { %v1248_v18 = vpop.f32.mrb[12].mxu0 }
 0x215   : > { %v1249_v19 = vpop.f32.mrb[13].mxu0 }
 0x216   : > { %v1250_v20 = vadd.f32 %v1249_v19, %v1248_v18  ;;  %v1251_v21 = vpop.f32.mrb[14].mxu0 }
 0x217   : > { %v1252_v22 = vpop.f32.mrb[15].mxu0 }
 0x218   : > { %v1253_v23 = vadd.f32 %v1252_v22, %v1251_v21  ;;  %v1272_v24 = vpop.f32.mrb[12].mxu1 }
 0x219   : > { %v1273_v25 = vpop.f32.mrb[13].mxu1 }
 0x21a   : > { %v1185_v44 = vpack.c.bf16 %v1253_v23, %v1250_v20  ;;  %v1274_v14 = vadd.f32 %v1273_v25, %v1272_v24  ;;  %v1275_v26 = vpop.f32.mrb[14].mxu1 }
 0x21b   : > { %v1276_v58 = vpop.f32.mrb[15].mxu1 }
 0x21c   : > { %1209 = vst [vmem:[%s2335_s22 + $0x18] sm:$0xff] %v1185_v44   ;;  %v1277_v27 = vadd.f32 %v1276_v58, %v1275_v26 }
 0x21e   : > { %v1205_v61 = vpack.c.bf16 %v1277_v27, %v1274_v14 }
 0x220   : > { %1213 = vst [vmem:[%s2335_s22 + $0x38] sm:$0xff] %v1205_v61  }
 0x221   : > { %1389 = shalt.err (!%p1386_p3)
}
 0x222   : > { %s1390_s5 = scalar_lea.hbm %s2349_s28, 1024  ;;  %s1394_s8 = scalar_lea.hbm %s2399_s2, 2048 }
 0x223   : > { %p1391_p4 = scmp.ne.s32.totalorder %s2349_s28, %s1390_s5  ;;  %p1395_p9 = scmp.lt.u32.totalorder %s2349_s28, %s2399_s2 }
 0x224   : > { %p1396_p10 = scmp.lt.u32.totalorder %s1394_s8, %s1390_s5  ;;  %p1398_p12 = scmp.lt.u32.totalorder %s1390_s5, %s2349_s28 }
 0x225   : > { %p1392_p7 = pnand %p1391_p4, %p1501_p5 }
 0x226   : > { %p1397_p11 = por %p1396_p10, %p1395_p9 }
 0x227   : > { %p1393_p8 = pneg %p1392_p7 }
 0x228   : > { %p1399_p13 = por %p1398_p12, %p1397_p11 }
 0x22a   : > { %p1400_p0 = pnand %p1399_p13, %p1393_p8 }
 0x22c   : > { %1403 = shalt.err (!%p1400_p0)
}
 0x22d   : > { %s1446_s17 = smov 64   ;;  %s1447_s25 = smov 4  }
 0x22e   : > { %1294 = dma.vmem_to_hbm [thread:$0]  (%p1501_p5), %s2351_s24, 1024, %s2349_s28, %s2356_s29, %s1446_s17, %s1446_s17, %s1447_s25  }
 0x22f PF: > { %p1300_p1 = scmp.ge.s32.totalorder %s1438_s12, 2  ;;  %s995_s21 = sand.u32 1, %s1426_s9  }
 0x230   : > { %s996_s22 = scalar_lea.sflag [#allocation3], %s995_s21 }
 0x231   : > { %p1297_p2 = pnand %p1300_p1, %p1505_p6 }
 0x233   : > { %1421 = dma.done.wait (!%p1297_p2), %s996_s22, 1024  }
 0x234   : > { %1423 = vsyncadd (!%p1297_p2), %s996_s22, 4294966272  ;;  %p12_p3 = scmp.ge.s32.totalorder %s1488_s15, 4   ;;  %s2573_s9 = smov %s1430_s10 }
 0x235   : > { %s2574_s10 = smov %s1434_s11  ;;  %s2575_s11 = smov %s1499_s18 }
 0x236   : > { %s2576_s12 = smov %s1488_s15  ;;  %14 = sbr.rel (!%p12_p3) target bundleno = 3 (0x3), region = 63 }
 0x23d   :  { %1001 = vsyncpa [#allocation3], 1 }
 0x23e   :  { %1003 = vsyncpa [#allocation3 + $0x1], 1 }

</bundles_post_ra>
